<compile_context>
chip_gen: v7x
topology: tpu7x:2x2x1
jax: 0.10.0
libtpu: 0.0.40
codegen_flags: <defaults>
</compile_context>

<pallas_src>
import jax
import jax.numpy as jnp
from jax.experimental import pallas as pl
from jax.experimental.pallas import tpu as pltpu

BN_EPS = 1e-5


def _make_predictor_kernel(num_h: int, th: int):
    """Kernel specialized (at trace time) on the number of hidden tiles."""

    def kernel(x_ref, w1_ref, g_ref, beta_ref, w2_ref, b2_ref, o_ref):
        h_idx = pl.program_id(1)  # hidden (K-reduction) axis

        # ---- Linear 1 (hidden tile): (B, in) bf16 @ (in, th) bf16 -> f32 ----
        # (no b1: a bias followed by train-mode BatchNorm is mathematically dead)
        h = jnp.dot(x_ref[...], w1_ref[...], preferred_element_type=jnp.float32)

        # gamma/beta are resident full-width; slice the current hidden tile.
        if num_h == 1:
            g = g_ref[...]
            bt = beta_ref[...]
        else:
            start = pl.multiple_of(h_idx * th, th)
            g = g_ref[:, pl.ds(start, th)]
            bt = beta_ref[:, pl.ds(start, th)]

        # ---- BatchNorm1d (training mode, biased batch stats, per column) ----
        # Single-pass statistics E[h^2]-E[h]^2 (clamped >= 0), folded into a
        # per-column scale/shift so the (B, th) elementwise chain is one FMA.
        inv_b = 1.0 / h.shape[0]
        mean = jnp.sum(h, axis=0, keepdims=True) * inv_b
        mean_sq = jnp.sum(h * h, axis=0, keepdims=True) * inv_b
        var = jnp.maximum(mean_sq - mean * mean, 0.0)
        scale = g * jax.lax.rsqrt(var + BN_EPS)        # (1, th)
        shift = bt - mean * scale                      # (1, th)

        # ---- ReLU ----
        h_relu = jnp.maximum(h * scale + shift, 0.0)

        # ---- Linear 2 partial product over this hidden (K) tile ----
        acc = jnp.dot(h_relu.astype(w2_ref.dtype), w2_ref[...],
                      preferred_element_type=jnp.float32)

        if num_h == 1:
            # Single hidden tile: one store, bias fused in.
            o_ref[...] = acc + b2_ref[...]
        else:
            @pl.when(h_idx == 0)
            def _store_first():
                o_ref[...] = acc

            @pl.when(h_idx > 0)
            def _accumulate():
                o_ref[...] += acc

            @pl.when(h_idx == num_h - 1)
            def _add_bias():
                o_ref[...] += b2_ref[...]

    return kernel


def _pick_hidden_tile(hidden: int, batch: int) -> int:
    # Single tile when small (grid machinery disappears); otherwise the largest
    # lane-dense, 256-aligned-when-possible tile, capped so the resident
    # (batch, th) f32 activation does not blow the 64-entry vreg file.
    if hidden <= 512 or hidden % 128 != 0:
        return hidden
    prefs = (512, 256, 128) if batch <= 64 else (256, 512, 128)
    for t in prefs:
        if hidden % t == 0:
            return t
    return hidden


def _pick_out_tile(out_dim: int) -> int:
    if out_dim <= 512 or out_dim % 128 != 0:
        return out_dim
    for t in (512, 256, 128):
        if out_dim % t == 0:
            return t
    return out_dim


def predictor_forward(x, w1_t, b1, gamma, beta, w2_t, b2):
    # b1 is accepted for parity with the PyTorch module's parameters but is
    # intentionally unused: BatchNorm's batch-mean subtraction cancels it.
    del b1
    # TODO(synk): BatchNorm1d running_mean/running_var training-time state
    # updates are not reproduced here (forward output only).

    B, in_dim = x.shape
    hidden, out_dim = w2_t.shape

    th = _pick_hidden_tile(hidden, B)
    tn = _pick_out_tile(out_dim)
    num_h = hidden // th if hidden % th == 0 else 1
    num_n = out_dim // tn if out_dim % tn == 0 else 1
    if num_h == 1:
        th = hidden
    if num_n == 1:
        tn = out_dim

    xb = x.astype(jnp.bfloat16)
    w1b = w1_t.astype(jnp.bfloat16)
    w2b = w2_t.astype(jnp.bfloat16)
    gamma = gamma.reshape(1, hidden).astype(jnp.float32)
    beta = beta.reshape(1, hidden).astype(jnp.float32)
    b2 = b2.reshape(1, out_dim).astype(jnp.float32)

    return pl.pallas_call(
        _make_predictor_kernel(num_h=num_h, th=th),
        out_shape=jax.ShapeDtypeStruct((B, out_dim), jnp.float32),
        grid=(num_n, num_h),
        in_specs=[
            pl.BlockSpec((B, in_dim), lambda j, h: (0, 0)),    # x (resident)
            pl.BlockSpec((in_dim, th), lambda j, h: (0, h)),   # w1_t hidden tile
            pl.BlockSpec((1, hidden), lambda j, h: (0, 0)),    # gamma (resident, full width)
            pl.BlockSpec((1, hidden), lambda j, h: (0, 0)),    # beta  (resident, full width)
            pl.BlockSpec((th, tn), lambda j, h: (h, j)),       # w2_t (hidden, out) tile
            pl.BlockSpec((1, tn), lambda j, h: (0, j)),        # b2 out tile
        ],
        out_specs=pl.BlockSpec((B, tn), lambda j, h: (0, j)),  # resident f32 accumulator
        compiler_params=pltpu.CompilerParams(
            # out_dim tiles are independent (megacore-parallel on v7x);
            # the hidden axis is a K reduction into the resident output block.
            dimension_semantics=("parallel", "arbitrary")),
    )(xb, w1b, gamma, beta, w2b, b2)


def reference_forward(x, w1_t, b1, gamma, beta, w2_t, b2):
    # Reference uses the same bf16 matmul operands / f32 accumulation and
    # DOES add b1 -- demonstrating that train-mode BN cancels it exactly.
    h = jnp.dot(x.astype(jnp.bfloat16), w1_t.astype(jnp.bfloat16),
                preferred_element_type=jnp.float32) + b1
    mean = jnp.mean(h, axis=0, keepdims=True)
    var = jnp.mean((h - mean) ** 2, axis=0, keepdims=True)
    h = (h - mean) * jax.lax.rsqrt(var + BN_EPS) * gamma + beta
    h = jnp.maximum(h, 0.0)
    return jnp.dot(h.astype(jnp.bfloat16), w2_t.astype(jnp.bfloat16),
                   preferred_element_type=jnp.float32) + b2


if __name__ == "__main__":
    # Small but MXU/lane-friendly shapes consistent with the module:
    # Predictor(in_dim=128, hidden_dim=256, out_dim=256), batch 128.
    # (v6e note: B=128 fills half the 256-row MXU; use B>=256 if the caller allows.)
    B, in_dim, hidden, out_dim = 128, 128, 256, 256

    key = jax.random.PRNGKey(0)
    kx, kw1, kb1, kg, kbt, kw2, kb2 = jax.random.split(key, 7)

    x = jax.random.normal(kx, (B, in_dim), dtype=jnp.float32)

    # Deterministic synthetic parameter init (PyTorch-like uniform bounds);
    # BN affine params randomized (not 1/0) to exercise the scale/shift fold.
    bound1 = 1.0 / jnp.sqrt(jnp.float32(in_dim))
    w1_t = jax.random.uniform(kw1, (in_dim, hidden), minval=-bound1, maxval=bound1,
                              dtype=jnp.float32)
    b1 = jax.random.uniform(kb1, (1, hidden), minval=-bound1, maxval=bound1,
                            dtype=jnp.float32)
    gamma = jax.random.uniform(kg, (1, hidden), minval=0.5, maxval=1.5,
                               dtype=jnp.float32)
    beta = 0.1 * jax.random.normal(kbt, (1, hidden), dtype=jnp.float32)

    bound2 = 1.0 / jnp.sqrt(jnp.float32(hidden))
    w2_t = jax.random.uniform(kw2, (hidden, out_dim), minval=-bound2, maxval=bound2,
                              dtype=jnp.float32)
    b2 = jax.random.uniform(kb2, (1, out_dim), minval=-bound2, maxval=bound2,
                            dtype=jnp.float32)

    out = predictor_forward(x, w1_t, b1, gamma, beta, w2_t, b2)
    out = jax.block_until_ready(out)

    ref = reference_forward(x, w1_t, b1, gamma, beta, w2_t, b2)
    assert out.shape == (B, out_dim)
    max_err = float(jnp.max(jnp.abs(out - ref)))
    assert jnp.allclose(out, ref, atol=3e-2, rtol=3e-2), max_err

    print("KERNEL_OK")
</pallas_src>

<mosaic_0001>
module attributes {stable_mosaic.version = 11 : i64} {
  func.func @kernel(%arg0: i32, %arg1: i32, %arg2: memref<128x128xbf16, #tpu.memory_space<vmem>>, %arg3: memref<128x256xbf16, #tpu.memory_space<vmem>>, %arg4: memref<1x256xf32, #tpu.memory_space<vmem>>, %arg5: memref<1x256xf32, #tpu.memory_space<vmem>>, %arg6: memref<256x256xbf16, #tpu.memory_space<vmem>>, %arg7: memref<1x256xf32, #tpu.memory_space<vmem>>, %arg8: memref<128x256xf32, #tpu.memory_space<vmem>>) attributes {dimension_semantics = [#tpu.dimension_semantics<parallel>, #tpu.dimension_semantics<arbitrary>], iteration_bounds = array<i64: 1, 1>, scalar_prefetch = 0 : i64, scratch_operands = 0 : i64, tpu.core_type = #tpu.core_type<tc>, window_params = [{pipeline_mode = #tpu.pipeline_mode<synchronous>, transform_indices = @transform_0, window_bounds = array<i64: 128, 128>}, {transform_indices = @transform_1, window_bounds = array<i64: 128, 256>}, {pipeline_mode = #tpu.pipeline_mode<synchronous>, transform_indices = @transform_2, window_bounds = array<i64: 1, 256>}, {pipeline_mode = #tpu.pipeline_mode<synchronous>, transform_indices = @transform_3, window_bounds = array<i64: 1, 256>}, {transform_indices = @transform_4, window_bounds = array<i64: 256, 256>}, {transform_indices = @transform_5, window_bounds = array<i64: 1, 256>}, {transform_indices = @transform_6, window_bounds = array<i64: 128, 256>}]} {
    %c0 = arith.constant 0 : index
    %c0_0 = arith.constant 0 : index
    %0 = vector.load %arg2[%c0, %c0_0] : memref<128x128xbf16, #tpu.memory_space<vmem>>, vector<128x128xbf16>
    %c0_1 = arith.constant 0 : index
    %c0_2 = arith.constant 0 : index
    %1 = vector.load %arg3[%c0_1, %c0_2] : memref<128x256xbf16, #tpu.memory_space<vmem>>, vector<128x256xbf16>
    %cst = arith.constant dense<0.000000e+00> : vector<128x256xf32>
    %2 = tpu.matmul %0, %1, %cst {dimension_numbers = #tpu.dot_dimension_numbers<[1], [0], [0], [1], [0, 0, 1, 1], [], []>} : vector<128x128xbf16>, vector<128x256xbf16>, vector<128x256xf32> -> vector<128x256xf32>
    %c0_3 = arith.constant 0 : index
    %c0_4 = arith.constant 0 : index
    %3 = vector.load %arg4[%c0_3, %c0_4] : memref<1x256xf32, #tpu.memory_space<vmem>>, vector<1x256xf32>
    %c0_5 = arith.constant 0 : index
    %c0_6 = arith.constant 0 : index
    %4 = vector.load %arg5[%c0_5, %c0_6] : memref<1x256xf32, #tpu.memory_space<vmem>>, vector<1x256xf32>
    %cst_7 = arith.constant dense<0.000000e+00> : vector<256xf32>
    %5 = vector.multi_reduction <add>, %2, %cst_7 [0] : vector<128x256xf32> to vector<256xf32>
    %6 = vector.shape_cast %5 : vector<256xf32> to vector<1x256xf32>
    %cst_8 = arith.constant 7.812500e-03 : f32
    %7 = vector.broadcast %cst_8 : f32 to vector<1x256xf32>
    %8 = arith.mulf %6, %7 : vector<1x256xf32>
    %9 = arith.mulf %2, %2 : vector<128x256xf32>
    %cst_9 = arith.constant dense<0.000000e+00> : vector<256xf32>
    %10 = vector.multi_reduction <add>, %9, %cst_9 [0] : vector<128x256xf32> to vector<256xf32>
    %11 = vector.shape_cast %10 : vector<256xf32> to vector<1x256xf32>
    %cst_10 = arith.constant 7.812500e-03 : f32
    %12 = vector.broadcast %cst_10 : f32 to vector<1x256xf32>
    %13 = arith.mulf %11, %12 : vector<1x256xf32>
    %14 = arith.mulf %8, %8 : vector<1x256xf32>
    %15 = arith.subf %13, %14 : vector<1x256xf32>
    %cst_11 = arith.constant 0.000000e+00 : f32
    %16 = vector.broadcast %cst_11 : f32 to vector<1x256xf32>
    %17 = arith.maximumf %15, %16 : vector<1x256xf32>
    %cst_12 = arith.constant 9.99999974E-6 : f32
    %18 = vector.broadcast %cst_12 : f32 to vector<1x256xf32>
    %19 = arith.addf %17, %18 : vector<1x256xf32>
    %20 = math.rsqrt %19 : vector<1x256xf32>
    %21 = arith.mulf %3, %20 : vector<1x256xf32>
    %22 = arith.mulf %8, %21 : vector<1x256xf32>
    %23 = arith.subf %4, %22 : vector<1x256xf32>
    %24 = vector.broadcast %21 : vector<1x256xf32> to vector<128x256xf32>
    %25 = arith.mulf %2, %24 : vector<128x256xf32>
    %26 = vector.broadcast %23 : vector<1x256xf32> to vector<128x256xf32>
    %27 = arith.addf %25, %26 : vector<128x256xf32>
    %cst_13 = arith.constant 0.000000e+00 : f32
    %28 = vector.broadcast %cst_13 : f32 to vector<128x256xf32>
    %29 = arith.maximumf %27, %28 : vector<128x256xf32>
    %30 = arith.truncf %29 : vector<128x256xf32> to vector<128x256xbf16>
    %c0_14 = arith.constant 0 : index
    %c0_15 = arith.constant 0 : index
    %31 = vector.load %arg6[%c0_14, %c0_15] : memref<256x256xbf16, #tpu.memory_space<vmem>>, vector<256x256xbf16>
    %cst_16 = arith.constant dense<0.000000e+00> : vector<128x256xf32>
    %32 = tpu.matmul %30, %31, %cst_16 {dimension_numbers = #tpu.dot_dimension_numbers<[1], [0], [0], [1], [0, 0, 1, 1], [], []>} : vector<128x256xbf16>, vector<256x256xbf16>, vector<128x256xf32> -> vector<128x256xf32>
    %c0_17 = arith.constant 0 : index
    %c0_18 = arith.constant 0 : index
    %33 = vector.load %arg7[%c0_17, %c0_18] : memref<1x256xf32, #tpu.memory_space<vmem>>, vector<1x256xf32>
    %34 = vector.broadcast %33 : vector<1x256xf32> to vector<128x256xf32>
    %35 = arith.addf %32, %34 : vector<128x256xf32>
    %c0_19 = arith.constant 0 : index
    %c0_20 = arith.constant 0 : index
    %36 = vector.load %arg8[%c0_19, %c0_20] : memref<128x256xf32, #tpu.memory_space<vmem>>, vector<128x256xf32>
    tpu.vector_store %arg8[%c0_19, %c0_20], %35 {strides = array<i32>} : memref<128x256xf32, #tpu.memory_space<vmem>>, vector<128x256xf32>,
    return
  }
  func.func @transform_0(%arg0: i32, %arg1: i32) -> (i32, i32) {
    %c0_i32 = arith.constant 0 : i32
    %c0_i32_0 = arith.constant 0 : i32
    %c0_i32_1 = arith.constant 0 : i32
    return %c0_i32, %c0_i32_0 : i32, i32
  }
  func.func @transform_1(%arg0: i32, %arg1: i32) -> (i32, i32) {
    %c0_i32 = arith.constant 0 : i32
    %c0_i32_0 = arith.constant 0 : i32
    return %c0_i32, %arg1 : i32, i32
  }
  func.func @transform_2(%arg0: i32, %arg1: i32) -> (i32, i32) {
    %c0_i32 = arith.constant 0 : i32
    %c0_i32_0 = arith.constant 0 : i32
    %c0_i32_1 = arith.constant 0 : i32
    return %c0_i32, %c0_i32_0 : i32, i32
  }
  func.func @transform_3(%arg0: i32, %arg1: i32) -> (i32, i32) {
    %c0_i32 = arith.constant 0 : i32
    %c0_i32_0 = arith.constant 0 : i32
    %c0_i32_1 = arith.constant 0 : i32
    return %c0_i32, %c0_i32_0 : i32, i32
  }
  func.func @transform_4(%arg0: i32, %arg1: i32) -> (i32, i32) {
    %c0_i32 = arith.constant 0 : i32
    return %arg1, %arg0 : i32, i32
  }
  func.func @transform_5(%arg0: i32, %arg1: i32) -> (i32, i32) {
    %c0_i32 = arith.constant 0 : i32
    %c0_i32_0 = arith.constant 0 : i32
    return %c0_i32, %arg0 : i32, i32
  }
  func.func @transform_6(%arg0: i32, %arg1: i32) -> (i32, i32) {
    %c0_i32 = arith.constant 0 : i32
    %c0_i32_0 = arith.constant 0 : i32
    return %c0_i32, %arg0 : i32, i32
  }
}

</mosaic_0001>

<bundles_post_ra>
// kernel: tpu_custom_call.1
= control target key start
LH: loop header
LB: loop body
LE: loop exit
PB: predicated region body
PF: predicated region fallthrough
CT: control target
= control target key end

     0   :  { %11 = vsyncpa [#allocation3], 0  ;;  %s1716_s0 = inlined_call_operand.hbm [shape: bf16[128,128], index: 0, kind: input, shape index: {}]   ;;  %s1717_s1 = inlined_call_operand.hbm [shape: bf16[128,256], index: 1, kind: input, shape index: {}]   ;;  %s1718_s2 = inlined_call_operand.vmem [shape: f32[1,256], index: 2, kind: input, shape index: {}]   ;;  %s1719_s3 = inlined_call_operand.vmem [shape: f32[1,256], index: 3, kind: input, shape index: {}]   ;;  %s1720_s4 = inlined_call_operand.hbm [shape: bf16[256,256], index: 4, kind: input, shape index: {}]   ;;  %s1721_s5 = inlined_call_operand.vmem [shape: f32[1,256], index: 5, kind: input, shape index: {}]   ;;  %s1722_s6 = inlined_call_operand.hbm [shape: f32[128,256], index: 6, kind: output, shape index: {}]  }
   0x1   :  { %12 = vsyncpa [#allocation6], 0 }
   0x2   :  { %13 = vsyncpa [#allocation4], 0  ;;  %s1290_s21 = smov [#allocation5]   ;;  %s1196_s25 = scalar_lea.hbm %s1717_s1, 2048 }
   0x3   :  { %s31_s22 = sshll.u32 %s1290_s21, 4  ;;  %p1197_p0 = scmp.ne.s32.totalorder %s1717_s1, %s1196_s25  ;;  %s32_s22 = int_to_ptr.vmem [resolvable:$true] %s31_s22 }
   0x4   :  { %p1200_p1 = scmp.lt.u32.totalorder %s1196_s25, %s1717_s1 }
   0x6   :  { %p1202_p2 = pnand %p1200_p1, %p1197_p0 }
   0x8   :  { %1205 = shalt.err (!%p1202_p2)
}
   0x9   :  { %s1206_s30 = scalar_lea.vmem %s32_s22, 2048  ;;  %p1211_p4 = scmp.lt.s32.totalorder %s32_s22, %s32_s22 }
   0xa   :  { %p1207_p3 = scmp.ne.s32.totalorder %s32_s22, %s1206_s30  ;;  %p1212_p5 = scmp.lt.s32.totalorder %s1206_s30, %s1206_s30 }
   0xc   :  { %p1213_p6 = por %p1212_p5, %p1211_p4 }
   0xe   :  { %p1214_p7 = pnand %p1213_p6, %p1207_p3 }
  0x10   :  { %1217 = shalt.err (!%p1214_p7)
}
  0x11   :  { %s1291_s7 = smov 128   ;;  %s1292_s8 = smov 8  }
  0x12   :  { %37 = dma.hbm_to_vmem [thread:$0]  %s1717_s1, 2048, %s32_s22, [#allocation6], %s1291_s7, %s1291_s7, %s1292_s8  }
  0x13   :  { %s1293_s11 = smov [#allocation2]   ;;  %s1218_s15 = scalar_lea.hbm %s1716_s0, 1024 }
  0x14   :  { %s19_s12 = sshll.u32 %s1293_s11, 4  ;;  %p1219_p8 = scmp.ne.s32.totalorder %s1716_s0, %s1218_s15  ;;  %s20_s12 = int_to_ptr.vmem [resolvable:$true] %s19_s12 }
  0x15   :  { %p1222_p9 = scmp.lt.u32.totalorder %s1218_s15, %s1716_s0 }
  0x17   :  { %p1224_p10 = pnand %p1222_p9, %p1219_p8 }
  0x19   :  { %1227 = shalt.err (!%p1224_p10)
}
  0x1a   :  { %s1228_s20 = scalar_lea.vmem %s20_s12, 1024  ;;  %p1233_p12 = scmp.lt.s32.totalorder %s20_s12, %s20_s12 }
  0x1b   :  { %p1229_p11 = scmp.ne.s32.totalorder %s20_s12, %s1228_s20  ;;  %p1234_p13 = scmp.lt.s32.totalorder %s1228_s20, %s1228_s20 }
  0x1d   :  { %p1235_p0 = por %p1234_p13, %p1233_p12 }
  0x1f   :  { %p1236_p1 = pnand %p1235_p0, %p1229_p11 }
  0x21   :  { %1239 = shalt.err (!%p1236_p1)
}
  0x22   :  { %s1294_s1 = smov 64   ;;  %s1295_s21 = smov 4  }
  0x23   :  { %25 = dma.hbm_to_vmem [thread:$0]  %s1716_s0, 1024, %s20_s12, [#allocation3], %s1294_s1, %s1294_s1, %s1295_s21  }
  0x24   :  { %s1296_s24 = smov [#allocation7]   ;;  %s1240_s28 = scalar_lea.hbm %s1720_s4, 4096 }
  0x25   :  { %s47_s25 = sshll.u32 %s1296_s24, 4  ;;  %p1241_p2 = scmp.ne.s32.totalorder %s1720_s4, %s1240_s28  ;;  %s48_s25 = int_to_ptr.vmem [resolvable:$true] %s47_s25 }
  0x26   :  { %p1244_p3 = scmp.lt.u32.totalorder %s1240_s28, %s1720_s4 }
  0x28   :  { %p1246_p4 = pnand %p1244_p3, %p1241_p2 }
  0x2a   :  { %1249 = shalt.err (!%p1246_p4)
}
  0x2b   :  { %s1250_s11 = scalar_lea.vmem %s48_s25, 4096  ;;  %p1255_p6 = scmp.lt.s32.totalorder %s48_s25, %s48_s25 }
  0x2c   :  { %p1251_p5 = scmp.ne.s32.totalorder %s48_s25, %s1250_s11  ;;  %p1256_p7 = scmp.lt.s32.totalorder %s1250_s11, %s1250_s11 }
  0x2e   :  { %p1257_p8 = por %p1256_p7, %p1255_p6 }
  0x30   :  { %p1258_p9 = pnand %p1257_p8, %p1251_p5 }
  0x32   :  { %1261 = shalt.err (!%p1258_p9)
}
  0x33   :  { %53 = dma.hbm_to_vmem [thread:$0]  %s1720_s4, 4096, %s48_s25, [#allocation6], %s1291_s7, %s1291_s7, %s1292_s8  }
  0x34   :  { %1284 = dma.done.wait [#allocation3], 1024  }
  0x35   :  { %1285 = vsyncadd [#allocation3], 4294966272 }
  0x36   :  { %1286 = dma.done.wait [#allocation6], 6144  }
  0x37   :  { %1287 = vsyncadd [#allocation6], 4294961152  ;;  %v1297_v0 = vmov 0   ;;  %v1112_v1 = vld [vmem:[#allocation5 + $0x4] ss:$8 sps:$4 sm:$0xff]   ;;  %v1138_v19 = vld [vmem:[#allocation2 + $0x10] sm:$0xff]  }
  0x38   :  { %258 = vmatprep.mubr.bf16.mxu0 %v1297_v0  ;;  %v1114_v2 = vld [vmem:[#allocation5] ss:$8 sps:$4 sm:$0xff]   ;;  %226 = vmatprep.subr.bf16.mxu0 %v1112_v1  ;;  %v1115_v3 = vld [vmem:[#allocation5 + $0x14] ss:$8 sps:$4 sm:$0xff]   ;;  %v1117_v4 = vld [vmem:[#allocation5 + $0x10] ss:$8 sps:$4 sm:$0xff]  }
  0x39   :  { %227 = vmatpush1.bf16.msra.mxu0 %v1114_v2  ;;  %v1118_v5 = vld [vmem:[#allocation5 + $0x24] ss:$8 sps:$4 sm:$0xff]   ;;  %v1120_v6 = vld [vmem:[#allocation5 + $0x20] ss:$8 sps:$4 sm:$0xff]   ;;  %v1121_v7 = vld [vmem:[#allocation5 + $0x34] ss:$8 sps:$4 sm:$0xff]  }
  0x3a   :  { %228 = vmatprep.subr.bf16.mxu0 %v1115_v3  ;;  %v1123_v8 = vld [vmem:[#allocation5 + $0x30] ss:$8 sps:$4 sm:$0xff]   ;;  %v1124_v9 = vld [vmem:[#allocation5 + $0x44] ss:$8 sps:$4 sm:$0xff]   ;;  %v1126_v10 = vld [vmem:[#allocation5 + $0x40] ss:$8 sps:$4 sm:$0xff]  }
  0x3b   :  { %v1127_v11 = vld [vmem:[#allocation5 + $0x54] ss:$8 sps:$4 sm:$0xff]   ;;  %v1129_v12 = vld [vmem:[#allocation5 + $0x50] ss:$8 sps:$4 sm:$0xff]   ;;  %v1130_v13 = vld [vmem:[#allocation5 + $0x64] ss:$8 sps:$4 sm:$0xff]  }
  0x3c   :  { %v1132_v14 = vld [vmem:[#allocation5 + $0x60] ss:$8 sps:$4 sm:$0xff]   ;;  %v1133_v15 = vld [vmem:[#allocation5 + $0x74] ss:$8 sps:$4 sm:$0xff]   ;;  %v1135_v16 = vld [vmem:[#allocation5 + $0x70] ss:$8 sps:$4 sm:$0xff]  }
  0x3d   :  { %229 = vmatpush1.bf16.msra.mxu0 %v1117_v4  ;;  %v1136_v17 = vld [vmem:[#allocation2] sm:$0xff]   ;;  %v1137_v18 = vld [vmem:[#allocation2 + $0x8] sm:$0xff]   ;;  %v1139_v20 = vld [vmem:[#allocation2 + $0x18] sm:$0xff]  }
  0x3e   :  { %230 = vmatprep.subr.bf16.mxu0 %v1118_v5  ;;  %v1140_v21 = vld [vmem:[#allocation2 + $0x20] sm:$0xff]   ;;  %v1141_v22 = vld [vmem:[#allocation2 + $0x28] sm:$0xff]   ;;  %v1142_v23 = vld [vmem:[#allocation2 + $0x30] sm:$0xff]  }
  0x3f   :  { %v1143_v24 = vld [vmem:[#allocation2 + $0x38] sm:$0xff]   ;;  %v1146_v25 = vld [vmem:[#allocation7 + $0x4] ss:$8 sps:$4 sm:$0xff]   ;;  %v1144_v26 = vld [vmem:[#allocation7] ss:$8 sps:$4 sm:$0xff]  }
  0x40   :  { %1068 = vmatprep.subr.bf16.mxu1 %v1146_v25  ;;  %v1149_v27 = vld [vmem:[#allocation7 + $0x14] ss:$8 sps:$4 sm:$0xff]   ;;  %v1147_v28 = vld [vmem:[#allocation7 + $0x10] ss:$8 sps:$4 sm:$0xff]   ;;  %v1152_v29 = vld [vmem:[#allocation7 + $0x24] ss:$8 sps:$4 sm:$0xff]  }
  0x41   :  { %231 = vmatpush1.bf16.msra.mxu0 %v1120_v6  ;;  %1084 = vmatpush1.bf16.msra.mxu1 %v1144_v26  ;;  %v1150_v30 = vld [vmem:[#allocation7 + $0x20] ss:$8 sps:$4 sm:$0xff]   ;;  %v1155_v31 = vld [vmem:[#allocation7 + $0x34] ss:$8 sps:$4 sm:$0xff]   ;;  %v1153_v32 = vld [vmem:[#allocation7 + $0x30] ss:$8 sps:$4 sm:$0xff]  }
  0x42   :  { %232 = vmatprep.subr.bf16.mxu0 %v1121_v7  ;;  %1069 = vmatprep.subr.bf16.mxu1 %v1149_v27  ;;  %v1158_v33 = vld [vmem:[#allocation7 + $0x44] ss:$8 sps:$4 sm:$0xff]   ;;  %v1156_v34 = vld [vmem:[#allocation7 + $0x40] ss:$8 sps:$4 sm:$0xff]   ;;  %v1161_v35 = vld [vmem:[#allocation7 + $0x54] ss:$8 sps:$4 sm:$0xff]  }
  0x43   :  { %v1159_v36 = vld [vmem:[#allocation7 + $0x50] ss:$8 sps:$4 sm:$0xff]   ;;  %v1164_v37 = vld [vmem:[#allocation7 + $0x64] ss:$8 sps:$4 sm:$0xff]   ;;  %v1162_v38 = vld [vmem:[#allocation7 + $0x60] ss:$8 sps:$4 sm:$0xff]  }
  0x44   :  { %v1167_v39 = vld [vmem:[#allocation7 + $0x74] ss:$8 sps:$4 sm:$0xff]   ;;  %v1165_v40 = vld [vmem:[#allocation7 + $0x70] ss:$8 sps:$4 sm:$0xff]   ;;  %v1170_v41 = vld [vmem:[#allocation7 + $0x84] ss:$8 sps:$4 sm:$0xff]  }
  0x45   :  { %233 = vmatpush1.bf16.msra.mxu0 %v1123_v8  ;;  %1085 = vmatpush1.bf16.msra.mxu1 %v1147_v28  ;;  %v1168_v42 = vld [vmem:[#allocation7 + $0x80] ss:$8 sps:$4 sm:$0xff]   ;;  %v1173_v43 = vld [vmem:[#allocation7 + $0x94] ss:$8 sps:$4 sm:$0xff]   ;;  %v1171_v44 = vld [vmem:[#allocation7 + $0x90] ss:$8 sps:$4 sm:$0xff]  }
  0x46   :  { %234 = vmatprep.subr.bf16.mxu0 %v1124_v9  ;;  %1070 = vmatprep.subr.bf16.mxu1 %v1152_v29  ;;  %v1176_v45 = vld [vmem:[#allocation7 + $0xa4] ss:$8 sps:$4 sm:$0xff]   ;;  %v1174_v46 = vld [vmem:[#allocation7 + $0xa0] ss:$8 sps:$4 sm:$0xff]   ;;  %v1179_v47 = vld [vmem:[#allocation7 + $0xb4] ss:$8 sps:$4 sm:$0xff]  }
  0x47   :  { %v1177_v48 = vld [vmem:[#allocation7 + $0xb0] ss:$8 sps:$4 sm:$0xff]   ;;  %v1182_v49 = vld [vmem:[#allocation7 + $0xc4] ss:$8 sps:$4 sm:$0xff]   ;;  %v1180_v50 = vld [vmem:[#allocation7 + $0xc0] ss:$8 sps:$4 sm:$0xff]  }
  0x48   :  { %v1185_v51 = vld [vmem:[#allocation7 + $0xd4] ss:$8 sps:$4 sm:$0xff]   ;;  %v1183_v52 = vld [vmem:[#allocation7 + $0xd0] ss:$8 sps:$4 sm:$0xff]   ;;  %v1188_v53 = vld [vmem:[#allocation7 + $0xe4] ss:$8 sps:$4 sm:$0xff]  }
  0x49   :  { %235 = vmatpush1.bf16.msra.mxu0 %v1126_v10  ;;  %1086 = vmatpush1.bf16.msra.mxu1 %v1150_v30  ;;  %v1186_v54 = vld [vmem:[#allocation7 + $0xe0] ss:$8 sps:$4 sm:$0xff]   ;;  %v1189_v55 = vld [vmem:[#allocation7 + $0xf0] ss:$8 sps:$4 sm:$0xff]   ;;  %v1191_v56 = vld [vmem:[#allocation7 + $0xf4] ss:$8 sps:$4 sm:$0xff]  }
  0x4a   :  { %236 = vmatprep.subr.bf16.mxu0 %v1127_v11  ;;  %1071 = vmatprep.subr.bf16.mxu1 %v1155_v31 }
  0x4d   :  { %237 = vmatpush1.bf16.msra.mxu0 %v1129_v12  ;;  %1087 = vmatpush1.bf16.msra.mxu1 %v1153_v32 }
  0x4e   :  { %238 = vmatprep.subr.bf16.mxu0 %v1130_v13  ;;  %1072 = vmatprep.subr.bf16.mxu1 %v1158_v33 }
  0x51   :  { %239 = vmatpush1.bf16.msra.mxu0 %v1132_v14  ;;  %1088 = vmatpush1.bf16.msra.mxu1 %v1156_v34 }
  0x52   :  { %240 = vmatprep.subr.bf16.mxu0 %v1133_v15  ;;  %1073 = vmatprep.subr.bf16.mxu1 %v1161_v35 }
  0x55   :  { %241 = vmatpush1.bf16.msra.mxu0 %v1135_v16  ;;  %1089 = vmatpush1.bf16.msra.mxu1 %v1159_v36 }
  0x56   :  { %849 = vmatprep.subr.bf16.mxu0 %v1146_v25  ;;  %1074 = vmatprep.subr.bf16.mxu1 %v1164_v37 }
  0x58   :  { %259 = vmatmul.mubr.bf16.vlgmr.msra.gmra.mrb[0].mxu0 %v1136_v17 }
  0x59   :  { %268 = vmatprep.mubr.bf16.mxu0 %v1297_v0  ;;  %850 = vmatpush1.bf16.msra.mxu0 %v1144_v26 }
  0x5a   :  { %851 = vmatprep.subr.bf16.mxu0 %v1149_v27  ;;  %1090 = vmatpush1.bf16.msra.mxu1 %v1162_v38 }
  0x5b   :  { %1075 = vmatprep.subr.bf16.mxu1 %v1167_v39 }
  0x5d   :  { %852 = vmatpush1.bf16.msra.mxu0 %v1147_v28 }
  0x5e   :  { %853 = vmatprep.subr.bf16.mxu0 %v1152_v29  ;;  %1091 = vmatpush1.bf16.msra.mxu1 %v1165_v40 }
  0x5f   :  { %1076 = vmatprep.subr.bf16.mxu1 %v1170_v41 }
  0x60   :  { %269 = vmatmul.mubr.bf16.gmra.mrb[4].mxu0 %v1137_v18 }
  0x61   :  { %278 = vmatprep.mubr.bf16.mxu0 %v1297_v0  ;;  %854 = vmatpush1.bf16.msra.mxu0 %v1150_v30 }
  0x62   :  { %855 = vmatprep.subr.bf16.mxu0 %v1155_v31  ;;  %1092 = vmatpush1.bf16.msra.mxu1 %v1168_v42 }
  0x63   :  { %1077 = vmatprep.subr.bf16.mxu1 %v1173_v43 }
  0x65   :  { %856 = vmatpush1.bf16.msra.mxu0 %v1153_v32 }
  0x66   :  { %857 = vmatprep.subr.bf16.mxu0 %v1158_v33  ;;  %1093 = vmatpush1.bf16.msra.mxu1 %v1171_v44 }
  0x67   :  { %1078 = vmatprep.subr.bf16.mxu1 %v1176_v45 }
  0x68   :  { %279 = vmatmul.mubr.bf16.gmra.mrb[8].mxu0 %v1138_v19 }
  0x69   :  { %288 = vmatprep.mubr.bf16.mxu0 %v1297_v0  ;;  %858 = vmatpush1.bf16.msra.mxu0 %v1156_v34 }
  0x6a   :  { %859 = vmatprep.subr.bf16.mxu0 %v1161_v35  ;;  %1094 = vmatpush1.bf16.msra.mxu1 %v1174_v46 }
  0x6b   :  { %1079 = vmatprep.subr.bf16.mxu1 %v1179_v47 }
  0x6d   :  { %860 = vmatpush1.bf16.msra.mxu0 %v1159_v36 }
  0x6e   :  { %861 = vmatprep.subr.bf16.mxu0 %v1164_v37  ;;  %1095 = vmatpush1.bf16.msra.mxu1 %v1177_v48 }
  0x6f   :  { %1080 = vmatprep.subr.bf16.mxu1 %v1182_v49 }
  0x70   :  { %289 = vmatmul.mubr.bf16.gmra.mrb[12].mxu0 %v1139_v20 }
  0x71   :  { %298 = vmatprep.mubr.bf16.mxu0 %v1297_v0  ;;  %862 = vmatpush1.bf16.msra.mxu0 %v1162_v38 }
  0x72   :  { %863 = vmatprep.subr.bf16.mxu0 %v1167_v39  ;;  %1096 = vmatpush1.bf16.msra.mxu1 %v1180_v50 }
  0x73   :  { %1081 = vmatprep.subr.bf16.mxu1 %v1185_v51 }
  0x75   :  { %864 = vmatpush1.bf16.msra.mxu0 %v1165_v40 }
  0x76   :  { %865 = vmatprep.subr.bf16.mxu0 %v1170_v41  ;;  %1097 = vmatpush1.bf16.msra.mxu1 %v1183_v52 }
  0x77   :  { %1082 = vmatprep.subr.bf16.mxu1 %v1188_v53 }
  0x78   :  { %299 = vmatmul.mubr.bf16.gmra.mrb[16].mxu0 %v1140_v21 }
  0x79   :  { %308 = vmatprep.mubr.bf16.mxu0 %v1297_v0  ;;  %866 = vmatpush1.bf16.msra.mxu0 %v1168_v42 }
  0x7a   :  { %867 = vmatprep.subr.bf16.mxu0 %v1173_v43  ;;  %1098 = vmatpush1.bf16.msra.mxu1 %v1186_v54 }
  0x7b   :  { %1083 = vmatprep.subr.bf16.mxu1 %v1191_v56 }
  0x7d   :  { %868 = vmatpush1.bf16.msra.mxu0 %v1171_v44 }
  0x7e   :  { %869 = vmatprep.subr.bf16.mxu0 %v1176_v45  ;;  %1099 = vmatpush1.bf16.msra.mxu1 %v1189_v55 }
  0x80   :  { %309 = vmatmul.mubr.bf16.gmra.mrb[20].mxu0 %v1141_v22 }
  0x81   :  { %318 = vmatprep.mubr.bf16.mxu0 %v1297_v0  ;;  %870 = vmatpush1.bf16.msra.mxu0 %v1174_v46 }
  0x82   :  { %871 = vmatprep.subr.bf16.mxu0 %v1179_v47 }
  0x85   :  { %872 = vmatpush1.bf16.msra.mxu0 %v1177_v48 }
  0x86   :  { %873 = vmatprep.subr.bf16.mxu0 %v1182_v49 }
  0x88   :  { %319 = vmatmul.mubr.bf16.gmra.mrb[24].mxu0 %v1142_v23 }
  0x89   :  { %328 = vmatprep.mubr.bf16.mxu0 %v1297_v0  ;;  %874 = vmatpush1.bf16.msra.mxu0 %v1180_v50 }
  0x8a   :  { %875 = vmatprep.subr.bf16.mxu0 %v1185_v51 }
  0x8d   :  { %876 = vmatpush1.bf16.msra.mxu0 %v1183_v52 }
  0x8e   :  { %877 = vmatprep.subr.bf16.mxu0 %v1188_v53 }
  0x90   :  { %329 = vmatmul.mubr.bf16.gmra.mrb[28].mxu0 %v1143_v24 }
  0x91   :  { %878 = vmatpush1.bf16.msra.mxu0 %v1186_v54 }
  0x92   :  { %879 = vmatprep.subr.bf16.mxu0 %v1191_v56 }
  0x95   :  { %880 = vmatpush1.bf16.msra.mxu0 %v1189_v55 }
 0x12b   :  { %v1379_v57 = vpop.f32.mrb[0].mxu0 }
 0x12c   :  { %v1381_v58 = vpop.f32.mrb[1].mxu0  ;;  %v385_v60 = vmul.f32 %v1379_v57, %v1379_v57 }
 0x12d   :  { %v1383_v59 = vpop.f32.mrb[2].mxu0  ;;  %v386_v0 = vmul.f32 %v1381_v58, %v1381_v58 }
 0x12e   :  { %v341_v61 = vadd.f32 %v1383_v59, %v1379_v57  ;;  %v387_v62 = vmul.f32 %v1383_v59, %v1383_v59  ;;  %v1391_v63 = vpop.f32.mrb[3].mxu0 }
 0x12f   :  { %v362_v1 = vadd.f32 %v1391_v63, %v1381_v58  ;;  %v388_v2 = vmul.f32 %v1391_v63, %v1391_v63 }
 0x130   :  { %v417_v3 = vadd.f32 %v387_v62, %v385_v60 }
 0x131   :  { %v438_v4 = vadd.f32 %v388_v2, %v386_v0 }
 0x133   :  { %v1399_v5 = vpop.f32.mrb[4].mxu0 }
 0x134   :  { %v342_v6 = vadd.f32 %v341_v61, %v1399_v5  ;;  %v389_v7 = vmul.f32 %v1399_v5, %v1399_v5  ;;  %v1404_v8 = vpop.f32.mrb[5].mxu0 }
 0x135   :  { %v363_v9 = vadd.f32 %v362_v1, %v1404_v8  ;;  %v390_v10 = vmul.f32 %v1404_v8, %v1404_v8  ;;  %v1409_v11 = vpop.f32.mrb[6].mxu0 }
 0x136   :  { %v418_v12 = vadd.f32 %v417_v3, %v389_v7  ;;  %v343_v13 = vadd.f32 %v342_v6, %v1409_v11  ;;  %v391_v14 = vmul.f32 %v1409_v11, %v1409_v11  ;;  %v1414_v15 = vpop.f32.mrb[7].mxu0 }
 0x137   :  { %v439_v16 = vadd.f32 %v438_v4, %v390_v10  ;;  %v364_v17 = vadd.f32 %v363_v9, %v1414_v15  ;;  %v392_v18 = vmul.f32 %v1414_v15, %v1414_v15 }
 0x138   :  { %v419_v19 = vadd.f32 %v418_v12, %v391_v14 }
 0x139   :  { %v440_v20 = vadd.f32 %v439_v16, %v392_v18 }
 0x13b   :  { %v1419_v21 = vpop.f32.mrb[8].mxu0 }
 0x13c   :  { %v344_v22 = vadd.f32 %v343_v13, %v1419_v21  ;;  %v393_v23 = vmul.f32 %v1419_v21, %v1419_v21  ;;  %v1424_v24 = vpop.f32.mrb[9].mxu0 }
 0x13d   :  { %v365_v25 = vadd.f32 %v364_v17, %v1424_v24  ;;  %v394_v26 = vmul.f32 %v1424_v24, %v1424_v24  ;;  %v1429_v27 = vpop.f32.mrb[10].mxu0 }
 0x13e   :  { %v420_v28 = vadd.f32 %v419_v19, %v393_v23  ;;  %v345_v29 = vadd.f32 %v344_v22, %v1429_v27  ;;  %v395_v30 = vmul.f32 %v1429_v27, %v1429_v27  ;;  %v1434_v31 = vpop.f32.mrb[11].mxu0 }
 0x13f   :  { %v441_v32 = vadd.f32 %v440_v20, %v394_v26  ;;  %v366_v33 = vadd.f32 %v365_v25, %v1434_v31  ;;  %v396_v34 = vmul.f32 %v1434_v31, %v1434_v31 }
 0x140   :  { %v421_v35 = vadd.f32 %v420_v28, %v395_v30 }
 0x141   :  { %v442_v36 = vadd.f32 %v441_v32, %v396_v34 }
 0x143   :  { %v1439_v37 = vpop.f32.mrb[12].mxu0 }
 0x144   :  { %v346_v38 = vadd.f32 %v345_v29, %v1439_v37  ;;  %v397_v39 = vmul.f32 %v1439_v37, %v1439_v37  ;;  %v1444_v40 = vpop.f32.mrb[13].mxu0 }
 0x145   :  { %v367_v41 = vadd.f32 %v366_v33, %v1444_v40  ;;  %v398_v42 = vmul.f32 %v1444_v40, %v1444_v40  ;;  %v1449_v43 = vpop.f32.mrb[14].mxu0 }
 0x146   :  { %v422_v44 = vadd.f32 %v421_v35, %v397_v39  ;;  %v347_v45 = vadd.f32 %v346_v38, %v1449_v43  ;;  %v399_v46 = vmul.f32 %v1449_v43, %v1449_v43  ;;  %v1454_v47 = vpop.f32.mrb[15].mxu0 }
 0x147   :  { %v443_v48 = vadd.f32 %v442_v36, %v398_v42  ;;  %v368_v49 = vadd.f32 %v367_v41, %v1454_v47  ;;  %v400_v50 = vmul.f32 %v1454_v47, %v1454_v47 }
 0x148   :  { %v423_v51 = vadd.f32 %v422_v44, %v399_v46 }
 0x149   :  { %v444_v52 = vadd.f32 %v443_v48, %v400_v50 }
 0x14b   :  { %v1459_v53 = vpop.f32.mrb[16].mxu0 }
 0x14c   :  { %v348_v54 = vadd.f32 %v347_v45, %v1459_v53  ;;  %v401_v55 = vmul.f32 %v1459_v53, %v1459_v53  ;;  %v1464_v56 = vpop.f32.mrb[17].mxu0 }
 0x14d   :  { %v369_v60 = vadd.f32 %v368_v49, %v1464_v56  ;;  %v402_v61 = vmul.f32 %v1464_v56, %v1464_v56  ;;  %v1469_v62 = vpop.f32.mrb[18].mxu0 }
 0x14e   :  { %v424_v0 = vadd.f32 %v423_v51, %v401_v55  ;;  %v349_v1 = vadd.f32 %v348_v54, %v1469_v62  ;;  %v403_v2 = vmul.f32 %v1469_v62, %v1469_v62  ;;  %v1474_v3 = vpop.f32.mrb[19].mxu0 }
 0x14f   :  { %v445_v4 = vadd.f32 %v444_v52, %v402_v61  ;;  %v370_v6 = vadd.f32 %v369_v60, %v1474_v3  ;;  %v404_v7 = vmul.f32 %v1474_v3, %v1474_v3 }
 0x150   :  { %v425_v9 = vadd.f32 %v424_v0, %v403_v2 }
 0x151   :  { %v446_v10 = vadd.f32 %v445_v4, %v404_v7 }
 0x153   :  { %v1479_v12 = vpop.f32.mrb[20].mxu0 }
 0x154   :  { %v350_v13 = vadd.f32 %v349_v1, %v1479_v12  ;;  %v405_v14 = vmul.f32 %v1479_v12, %v1479_v12  ;;  %v1484_v16 = vpop.f32.mrb[21].mxu0 }
 0x155   :  { %v371_v17 = vadd.f32 %v370_v6, %v1484_v16  ;;  %v406_v18 = vmul.f32 %v1484_v16, %v1484_v16  ;;  %v1489_v19 = vpop.f32.mrb[22].mxu0 }
 0x156   :  { %v426_v20 = vadd.f32 %v425_v9, %v405_v14  ;;  %v351_v22 = vadd.f32 %v350_v13, %v1489_v19  ;;  %v407_v23 = vmul.f32 %v1489_v19, %v1489_v19  ;;  %v1494_v25 = vpop.f32.mrb[23].mxu0 }
 0x157   :  { %v447_v26 = vadd.f32 %v446_v10, %v406_v18  ;;  %v372_v28 = vadd.f32 %v371_v17, %v1494_v25  ;;  %v408_v29 = vmul.f32 %v1494_v25, %v1494_v25 }
 0x158   :  { %v427_v30 = vadd.f32 %v426_v20, %v407_v23 }
 0x159   :  { %v448_v32 = vadd.f32 %v447_v26, %v408_v29 }
 0x15b   :  { %v1499_v33 = vpop.f32.mrb[24].mxu0 }
 0x15c   :  { %v352_v34 = vadd.f32 %v351_v22, %v1499_v33  ;;  %v409_v35 = vmul.f32 %v1499_v33, %v1499_v33  ;;  %v1504_v36 = vpop.f32.mrb[25].mxu0 }
 0x15d   :  { %v373_v38 = vadd.f32 %v372_v28, %v1504_v36  ;;  %v410_v39 = vmul.f32 %v1504_v36, %v1504_v36  ;;  %v1509_v41 = vpop.f32.mrb[26].mxu0 }
 0x15e   :  { %v428_v42 = vadd.f32 %v427_v30, %v409_v35  ;;  %v353_v44 = vadd.f32 %v352_v34, %v1509_v41  ;;  %v411_v45 = vmul.f32 %v1509_v41, %v1509_v41  ;;  %v1514_v46 = vpop.f32.mrb[27].mxu0 }
 0x15f   :  { %v449_v48 = vadd.f32 %v448_v32, %v410_v39  ;;  %v374_v49 = vadd.f32 %v373_v38, %v1514_v46  ;;  %v412_v50 = vmul.f32 %v1514_v46, %v1514_v46 }
 0x160   :  { %v429_v51 = vadd.f32 %v428_v42, %v411_v45 }
 0x161   :  { %v450_v52 = vadd.f32 %v449_v48, %v412_v50 }
 0x163   :  { %v1519_v54 = vpop.f32.mrb[28].mxu0 }
 0x164   :  { %v354_v55 = vadd.f32 %v353_v44, %v1519_v54  ;;  %v413_v60 = vmul.f32 %v1519_v54, %v1519_v54  ;;  %v1524_v61 = vpop.f32.mrb[29].mxu0 }
 0x165   :  { %v375_v0 = vadd.f32 %v374_v49, %v1524_v61  ;;  %v414_v1 = vmul.f32 %v1524_v61, %v1524_v61  ;;  %v1529_v2 = vpop.f32.mrb[30].mxu0 }
 0x166   :  { %v430_v4 = vadd.f32 %v429_v51, %v413_v60  ;;  %v355_v6 = vadd.f32 %v354_v55, %v1529_v2  ;;  %v415_v7 = vmul.f32 %v1529_v2, %v1529_v2  ;;  %v1534_v9 = vpop.f32.mrb[31].mxu0 }
 0x167   :  { %v451_v10 = vadd.f32 %v450_v52, %v414_v1  ;;  %v376_v13 = vadd.f32 %v375_v0, %v1534_v9  ;;  %v416_v14 = vmul.f32 %v1534_v9, %v1534_v9 }
 0x168   :  { %v356_v17 = vrot.slane %v355_v6, 4  ;;  %v431_v18 = vadd.f32 %v430_v4, %v415_v7 }
 0x169   :  { %v377_v20 = vrot.slane %v376_v13, 4  ;;  %v452_v22 = vadd.f32 %v451_v10, %v416_v14 }
 0x16a   :  { %v357_v23 = vadd.f32 %v356_v17, %v355_v6  ;;  %v432_v26 = vrot.slane %v431_v18, 4 }
 0x16b   :  { %v378_v28 = vadd.f32 %v377_v20, %v376_v13  ;;  %v453_v29 = vrot.slane %v452_v22, 4 }
 0x16c   :  { %v358_v30 = vrot.slane %v357_v23, 2  ;;  %v433_v32 = vadd.f32 %v432_v26, %v431_v18 }
 0x16d   :  { %v379_v34 = vrot.slane %v378_v28, 2  ;;  %v454_v35 = vadd.f32 %v453_v29, %v452_v22 }
 0x16e   :  { %v359_v38 = vadd.f32 %v358_v30, %v357_v23  ;;  %v434_v39 = vrot.slane %v433_v32, 2  ;;  %v477_v30 = vlaneseq }
 0x16f   :  { %v380_v42 = vadd.f32 %v379_v34, %v378_v28  ;;  %v455_v44 = vrot.slane %v454_v35, 2  ;;  %v1298_v28 = vmov 1966171168  }
 0x170   :  { %v360_v45 = vrot.slane %v359_v38, 1  ;;  %v435_v48 = vadd.f32 %v434_v39, %v433_v32  ;;  %v475_v29 = vunpack.c.l.s4 %v1298_v28  ;;  %v478_v34 = vshrl.u32 %v477_v30, 7 }
 0x171   :  { %v381_v49 = vrot.slane %v380_v42, 1  ;;  %v456_v50 = vadd.f32 %v455_v44, %v454_v35 }
 0x172   :  { %v361_v51 = vadd.f32 %v360_v45, %v359_v38  ;;  %v436_v52 = vrot.slane %v435_v48, 1  ;;  %v476_v32 = vunpack.c.0.s8 %v475_v29  ;;  %v339_v45 = vld [vmem:[%s1718_s2] sm:$0x3] }
 0x173   :  { %v382_v55 = vadd.f32 %v381_v49, %v380_v42  ;;  %v457_v60 = vrot.slane %v456_v50, 1  ;;  %v1542_v49 = vsub.s32 0, %v478_v34 }
 0x174   :  { %v383_v0 = vmul.f32 0.0078125, %v361_v51  ;;  %v437_v1 = vadd.f32 %v436_v52, %v435_v48  ;;  %v479_v38 = vsub.s32 %v476_v32, %v478_v34 }
 0x175   :  { %v384_v4 = vmul.f32 0.0078125, %v382_v55  ;;  %v458_v6 = vadd.f32 %v457_v60, %v456_v50  ;;  %v1544_v50 = vsub.s32 1, %v478_v34 }
 0x176   :  { %v459_v7 = vmul.f32 0.0078125, %v437_v1  ;;  %v461_v10 = vmul.f32 %v383_v0, %v383_v0 }
 0x177   :  { %v460_v13 = vmul.f32 0.0078125, %v458_v6  ;;  %v462_v14 = vmul.f32 %v384_v4, %v384_v4 }
 0x178   :  { %v463_v17 = vsub.f32 %v459_v7, %v461_v10 }
 0x179   :  { %v464_v18 = vsub.f32 %v460_v13, %v462_v14 }
 0x17a   :  { %v465_v20 = vmax.f32 %v463_v17, 0.0 }
 0x17b   :  { %v466_v22 = vmax.f32 %v464_v18, 0.0 }
 0x17c   :  { %v467_v23 = vadd.f32 1e-05, %v465_v20 }
 0x17d   :  { %v468_v26 = vadd.f32 1e-05, %v466_v22 }
 0x17e   :  { %1192 = vrsqrt.f32 %v467_v23 }
 0x17f   :  { %1194 = vrsqrt.f32 %v468_v26 }
 0x188   :  { %v1193_v35 = vpop.eup %1192 }
 0x189   :  { %v1195_v39 = vpop.eup %1194 }
 0x18a   :  { %v473_v42 = vcombine.low %v1193_v35, %v1195_v39 }
 0x18c   :  { %v480_v44 = vrot.slane %v473_v42, %v479_v38 }
 0x18e   :  { %v487_v48 = vrot.slane %v480_v44, %v479_v38 }
 0x190   :  { %v489_v51 = vmul.f32 %v487_v48, %v339_v45 }
 0x192   :  { %v494_v52 = vrot.slane %v489_v51, %v1542_v49  ;;  %v498_v55 = vrot.slane %v489_v51, %v1544_v50 }
 0x194   :  { %v501_v60 = vmul.f32 %v494_v52, %v383_v0  ;;  %v502_v1 = vmul.f32 %v498_v55, %v384_v4  ;;  %v553_v6 = vmul.f32 %v498_v55, %v1534_v9  ;;  %v523_v7 = vmul.f32 %v498_v55, %v1381_v58 }
 0x195   :  { %v525_v10 = vmul.f32 %v498_v55, %v1391_v63  ;;  %v531_v13 = vmul.f32 %v498_v55, %v1424_v24  ;;  %v533_v14 = vmul.f32 %v498_v55, %v1434_v31  ;;  %v522_v17 = vmul.f32 %v494_v52, %v1379_v57 }
 0x196   :  { %v505_v18 = vcombine.low %v501_v60, %v502_v1  ;;  %v524_v20 = vmul.f32 %v494_v52, %v1383_v59  ;;  %v530_v22 = vmul.f32 %v494_v52, %v1419_v21  ;;  %v532_v0 = vmul.f32 %v494_v52, %v1429_v27  ;;  %v340_v59 = vld [vmem:[%s1719_s3] sm:$0x3] }
 0x197   :  { %v527_v4 = vmul.f32 %v498_v55, %v1404_v8  ;;  %v529_v9 = vmul.f32 %v498_v55, %v1414_v15  ;;  %v535_v58 = vmul.f32 %v498_v55, %v1444_v40  ;;  %v537_v63 = vmul.f32 %v498_v55, %v1454_v47 }
 0x198   :  { %v512_v24 = vrot.slane %v505_v18, %v479_v38  ;;  %v526_v31 = vmul.f32 %v494_v52, %v1399_v5  ;;  %v528_v57 = vmul.f32 %v494_v52, %v1409_v11  ;;  %v534_v23 = vmul.f32 %v494_v52, %v1439_v37 }
 0x199   :  { %v536_v21 = vmul.f32 %v494_v52, %v1449_v43  ;;  %v539_v8 = vmul.f32 %v498_v55, %v1464_v56  ;;  %v541_v15 = vmul.f32 %v498_v55, %v1474_v3  ;;  %v1571_v27 = vmul.f32 %v494_v52, %v1459_v53 }
 0x19a   :  { %v519_v40 = vrot.slane %v512_v24, %v479_v38  ;;  %v1574_v5 = vmul.f32 %v494_v52, %v1469_v62  ;;  %v1577_v11 = vmul.f32 %v498_v55, %v1484_v16  ;;  %v1580_v37 = vmul.f32 %v498_v55, %v1494_v25 }
 0x19b   :  { %v1583_v47 = vmul.f32 %v494_v52, %v1479_v12  ;;  %v1586_v43 = vmul.f32 %v494_v52, %v1489_v19  ;;  %v1589_v56 = vmul.f32 %v498_v55, %v1504_v36  ;;  %v1592_v53 = vmul.f32 %v498_v55, %v1514_v46 }
 0x19c   :  { %v521_v62 = vsub.f32 %v340_v59, %v519_v40  ;;  %v1595_v3 = vmul.f32 %v494_v52, %v1499_v33  ;;  %v1598_v16 = vmul.f32 %v494_v52, %v1509_v41  ;;  %v1601_v25 = vmul.f32 %v498_v55, %v1524_v61 }
 0x19d   :  { %v1604_v12 = vmul.f32 %v494_v52, %v1519_v54  ;;  %v1607_v19 = vmul.f32 %v494_v52, %v1529_v2 }
 0x19e   :  { %v1610_v36 = vrot.slane %v521_v62, %v1542_v49  ;;  %v1613_v46 = vrot.slane %v521_v62, %v1544_v50 }
 0x1a0   :  { %v1616_v33 = vadd.f32 %v1613_v46, %v553_v6  ;;  %v566_v41 = vadd.f32 %v1613_v46, %v523_v7  ;;  %v568_v61 = vadd.f32 %v1613_v46, %v525_v10  ;;  %v574_v26 = vadd.f32 %v1613_v46, %v531_v13 }
 0x1a1   :  { %v576_v54 = vadd.f32 %v1613_v46, %v533_v14  ;;  %v565_v2 = vadd.f32 %v1610_v36, %v522_v17  ;;  %v567_v28 = vadd.f32 %v1610_v36, %v524_v20  ;;  %v573_v29 = vadd.f32 %v1610_v36, %v530_v22 }
 0x1a2   :  { %v598_v30 = vmax.f32 %v566_v41, 0.0  ;;  %v600_v32 = vmax.f32 %v568_v61, 0.0  ;;  %v606_v34 = vmax.f32 %v574_v26, 0.0  ;;  %v575_v35 = vadd.f32 %v1610_v36, %v532_v0 }
 0x1a3   :  { %v608_v38 = vmax.f32 %v576_v54, 0.0  ;;  %v597_v39 = vmax.f32 %v565_v2, 0.0  ;;  %v599_v42 = vmax.f32 %v567_v28, 0.0  ;;  %v605_v44 = vmax.f32 %v573_v29, 0.0 }
 0x1a4   :  { %v630_v45 = vpack.c.bf16 %v600_v32, %v598_v30  ;;  %v607_v48 = vmax.f32 %v575_v35, 0.0  ;;  %v570_v51 = vadd.f32 %v1613_v46, %v527_v4  ;;  %v572_v52 = vadd.f32 %v1613_v46, %v529_v9 }
 0x1a5   :  { %v634_v55 = vpack.c.bf16 %v608_v38, %v606_v34  ;;  %v629_v60 = vpack.c.bf16 %v599_v42, %v597_v39  ;;  %v578_v1 = vadd.f32 %v1613_v46, %v535_v58  ;;  %v580_v6 = vadd.f32 %v1613_v46, %v537_v63 }
 0x1a6   :  { %881 = vmatprep.mubr.bf16.mxu0 %v630_v45  ;;  %v633_v7 = vpack.c.bf16 %v607_v48, %v605_v44  ;;  %v602_v10 = vmax.f32 %v570_v51, 0.0  ;;  %v604_v13 = vmax.f32 %v572_v52, 0.0  ;;  %v569_v14 = vadd.f32 %v1610_v36, %v526_v31 }
 0x1a7   :  { %901 = vmatprep.mubr.bf16.mxu1 %v634_v55  ;;  %882 = vmatmul.mubr.bf16.vlgmr.msra.gmra.mrb[32].mxu0 %v629_v60  ;;  %v610_v17 = vmax.f32 %v578_v1, 0.0  ;;  %v612_v18 = vmax.f32 %v580_v6, 0.0  ;;  %v571_v20 = vadd.f32 %v1610_v36, %v528_v57  ;;  %v577_v22 = vadd.f32 %v1610_v36, %v534_v23 }
 0x1a8   :  { %902 = vmatmul.mubr.bf16.vlgmr.msra.gmra.mrb[0].mxu1 %v633_v7  ;;  %v632_v0 = vpack.c.bf16 %v604_v13, %v602_v10  ;;  %v601_v4 = vmax.f32 %v569_v14, 0.0  ;;  %v579_v9 = vadd.f32 %v1610_v36, %v536_v21  ;;  %v582_v58 = vadd.f32 %v1613_v46, %v539_v8 }
 0x1a9   :  { %v636_v63 = vpack.c.bf16 %v612_v18, %v610_v17  ;;  %v603_v24 = vmax.f32 %v571_v20, 0.0  ;;  %v609_v59 = vmax.f32 %v577_v22, 0.0  ;;  %v584_v31 = vadd.f32 %v1613_v46, %v541_v15 }
 0x1aa   :  { %891 = vmatprep.mubr.bf16.mxu0 %v632_v0  ;;  %v611_v40 = vmax.f32 %v579_v9, 0.0  ;;  %v614_v62 = vmax.f32 %v582_v58, 0.0  ;;  %v581_v57 = vadd.f32 %v1610_v36, %v1571_v27  ;;  %v583_v23 = vadd.f32 %v1610_v36, %v1574_v5 }
 0x1ab   :  { %911 = vmatprep.mubr.bf16.mxu1 %v636_v63  ;;  %v631_v41 = vpack.c.bf16 %v603_v24, %v601_v4  ;;  %v616_v61 = vmax.f32 %v584_v31, 0.0  ;;  %v586_v21 = vadd.f32 %v1613_v46, %v1577_v11  ;;  %v588_v8 = vadd.f32 %v1613_v46, %v1580_v37 }
 0x1ac   :  { %v635_v26 = vpack.c.bf16 %v611_v40, %v609_v59  ;;  %v613_v15 = vmax.f32 %v581_v57, 0.0  ;;  %v615_v54 = vmax.f32 %v583_v23, 0.0  ;;  %v585_v2 = vadd.f32 %v1610_v36, %v1583_v47 }
 0x1ad   :  { %v638_v28 = vpack.c.bf16 %v616_v61, %v614_v62  ;;  %v618_v27 = vmax.f32 %v586_v21, 0.0  ;;  %v620_v29 = vmax.f32 %v588_v8, 0.0  ;;  %v587_v5 = vadd.f32 %v1610_v36, %v1586_v43 }
 0x1ae   :  { %v637_v30 = vpack.c.bf16 %v615_v54, %v613_v15  ;;  %v617_v32 = vmax.f32 %v585_v2, 0.0  ;;  %v590_v11 = vadd.f32 %v1613_v46, %v1589_v56  ;;  %v592_v37 = vadd.f32 %v1613_v46, %v1592_v53 }
 0x1af   :  { %892 = vmatmul.mubr.bf16.gmra.mrb[36].mxu0 %v631_v41  ;;  %v640_v34 = vpack.c.bf16 %v620_v29, %v618_v27  ;;  %v619_v35 = vmax.f32 %v587_v5, 0.0  ;;  %v589_v47 = vadd.f32 %v1610_v36, %v1595_v3  ;;  %v591_v38 = vadd.f32 %v1610_v36, %v1598_v16 }
 0x1b0   :  { %912 = vmatmul.mubr.bf16.gmra.mrb[4].mxu1 %v635_v26  ;;  %v622_v39 = vmax.f32 %v590_v11, 0.0  ;;  %v624_v43 = vmax.f32 %v592_v37, 0.0  ;;  %v594_v42 = vadd.f32 %v1613_v46, %v1601_v25  ;;  %v628_v56 = vmax.f32 %v1616_v33, 0.0  ;;  %v677_v25 = vld [vmem:[%s1721_s5] sm:$0x3]  ;;  %s1299_s5 = smov [#allocation8]  }
 0x1b1   :  { %921 = vmatprep.mubr.bf16.mxu1 %v638_v28  ;;  %v639_v44 = vpack.c.bf16 %v619_v35, %v617_v32  ;;  %v621_v53 = vmax.f32 %v589_v47, 0.0  ;;  %v623_v45 = vmax.f32 %v591_v38, 0.0  ;;  %v593_v48 = vadd.f32 %v1610_v36, %v1604_v12  ;;  %s999_s14 = sshll.u32 %s1299_s5, 4  ;;  %s1000_s14 = int_to_ptr.vmem [resolvable:$true] %s999_s14 }
 0x1b2   :  { %v642_v51 = vpack.c.bf16 %v624_v43, %v622_v39  ;;  %v626_v3 = vmax.f32 %v594_v42, 0.0  ;;  %v595_v16 = vadd.f32 %v1610_v36, %v1607_v19  ;;  %v1667_v12 = vrot.slane %v677_v25, %v1542_v49  ;;  %s1262_s15 = scalar_lea.vmem %s1000_s14, 4096  ;;  %p1267_p11 = scmp.lt.s32.totalorder %s1000_s14, %s1000_s14 }
 0x1b3   :  { %v641_v52 = vpack.c.bf16 %v623_v45, %v621_v53  ;;  %v625_v55 = vmax.f32 %v593_v48, 0.0  ;;  %v1670_v19 = vrot.slane %v677_v25, %v1544_v50  ;;  %p1263_p10 = scmp.ne.s32.totalorder %s1000_s14, %s1262_s15  ;;  %p1268_p12 = scmp.lt.s32.totalorder %s1262_s15, %s1262_s15 }
 0x1b4   :  { %v644_v60 = vpack.c.bf16 %v628_v56, %v626_v3  ;;  %v627_v1 = vmax.f32 %v595_v16, 0.0 }
 0x1b5   :  { %p1269_p13 = por %p1268_p12, %p1267_p11 }
 0x1b6   :  { %v643_v6 = vpack.c.bf16 %v627_v1, %v625_v55 }
 0x1b7   :  { %p1270_p0 = pnand %p1269_p13, %p1263_p10 }
 0x1b8   :  { %922 = vmatmul.mubr.bf16.gmra.mrb[8].mxu1 %v637_v30 }
 0x1b9   :  { %931 = vmatprep.mubr.bf16.mxu1 %v640_v34 }
 0x1c0   :  { %932 = vmatmul.mubr.bf16.gmra.mrb[12].mxu1 %v639_v44 }
 0x1c1   :  { %941 = vmatprep.mubr.bf16.mxu1 %v642_v51 }
 0x1c8   :  { %942 = vmatmul.mubr.bf16.gmra.mrb[16].mxu1 %v641_v52 }
 0x1c9   :  { %951 = vmatprep.mubr.bf16.mxu1 %v644_v60 }
 0x1d0   :  { %952 = vmatmul.mubr.bf16.gmra.mrb[20].mxu1 %v643_v6 }
 0x27a   :  { %v883_v36 = vpop.f32.mrb[32].mxu0 }
 0x27b   :  { %v884_v46 = vadd.f32 %v883_v36, %v1667_v12  ;;  %v903_v33 = vpop.f32.mrb[0].mxu1  ;;  %v885_v7 = vpop.f32.mrb[33].mxu0 }
 0x27c   :  { %v904_v10 = vadd.f32 %v903_v33, %v1667_v12  ;;  %v886_v13 = vadd.f32 %v885_v7, %v1670_v19  ;;  %v905_v14 = vpop.f32.mrb[1].mxu1  ;;  %v887_v17 = vpop.f32.mrb[34].mxu0 }
 0x27d   :  { %962 = vst [vmem:[#allocation8] sm:$0xff] %v884_v46  ;;  %v906_v18 = vadd.f32 %v905_v14, %v1670_v19  ;;  %v888_v49 = vadd.f32 %v887_v17, %v1667_v12  ;;  %v907_v20 = vpop.f32.mrb[2].mxu1  ;;  %v889_v22 = vpop.f32.mrb[35].mxu0 }
 0x27e   :  { %970 = vst [vmem:[#allocation8 + $0x40] sm:$0xff] %v904_v10  ;;  %963 = vst [vmem:[#allocation8 + $0x8] sm:$0xff] %v886_v13  ;;  %v908_v50 = vadd.f32 %v907_v20, %v1667_v12  ;;  %v890_v0 = vadd.f32 %v889_v22, %v1670_v19  ;;  %v909_v4 = vpop.f32.mrb[3].mxu1 }
 0x27f   :  { %971 = vst [vmem:[#allocation8 + $0x48] sm:$0xff] %v906_v18  ;;  %964 = vst [vmem:[#allocation8 + $0x10] sm:$0xff] %v888_v49  ;;  %v910_v9 = vadd.f32 %v909_v4, %v1670_v19 }
 0x280   :  { %972 = vst [vmem:[#allocation8 + $0x50] sm:$0xff] %v908_v50  ;;  %965 = vst [vmem:[#allocation8 + $0x18] sm:$0xff] %v890_v0 }
 0x281   :  { %973 = vst [vmem:[#allocation8 + $0x58] sm:$0xff] %v910_v9 }
 0x282   :  { %v893_v58 = vpop.f32.mrb[36].mxu0 }
 0x283   :  { %v894_v63 = vadd.f32 %v893_v58, %v1667_v12  ;;  %v913_v24 = vpop.f32.mrb[4].mxu1  ;;  %v895_v59 = vpop.f32.mrb[37].mxu0 }
 0x284   :  { %v914_v31 = vadd.f32 %v913_v24, %v1667_v12  ;;  %v896_v40 = vadd.f32 %v895_v59, %v1670_v19  ;;  %v915_v62 = vpop.f32.mrb[5].mxu1  ;;  %v897_v57 = vpop.f32.mrb[38].mxu0 }
 0x285   :  { %966 = vst [vmem:[#allocation8 + $0x20] sm:$0xff] %v894_v63  ;;  %v916_v23 = vadd.f32 %v915_v62, %v1670_v19  ;;  %v898_v41 = vadd.f32 %v897_v57, %v1667_v12  ;;  %v917_v61 = vpop.f32.mrb[6].mxu1  ;;  %v899_v21 = vpop.f32.mrb[39].mxu0 }
 0x286   :  { %974 = vst [vmem:[#allocation8 + $0x60] sm:$0xff] %v914_v31  ;;  %967 = vst [vmem:[#allocation8 + $0x28] sm:$0xff] %v896_v40  ;;  %v918_v8 = vadd.f32 %v917_v61, %v1667_v12  ;;  %v900_v26 = vadd.f32 %v899_v21, %v1670_v19  ;;  %v919_v15 = vpop.f32.mrb[7].mxu1 }
 0x287   :  { %975 = vst [vmem:[#allocation8 + $0x68] sm:$0xff] %v916_v23  ;;  %968 = vst [vmem:[#allocation8 + $0x30] sm:$0xff] %v898_v41  ;;  %v920_v54 = vadd.f32 %v919_v15, %v1670_v19 }
 0x288   :  { %976 = vst [vmem:[#allocation8 + $0x70] sm:$0xff] %v918_v8  ;;  %969 = vst [vmem:[#allocation8 + $0x38] sm:$0xff] %v900_v26 }
 0x289   :  { %977 = vst [vmem:[#allocation8 + $0x78] sm:$0xff] %v920_v54 }
 0x28b   :  { %v923_v2 = vpop.f32.mrb[8].mxu1 }
 0x28c   :  { %v924_v28 = vadd.f32 %v923_v2, %v1667_v12  ;;  %v925_v27 = vpop.f32.mrb[9].mxu1 }
 0x28d   :  { %v926_v29 = vadd.f32 %v925_v27, %v1670_v19  ;;  %v927_v5 = vpop.f32.mrb[10].mxu1 }
 0x28e   :  { %978 = vst [vmem:[#allocation8 + $0x80] sm:$0xff] %v924_v28  ;;  %v928_v30 = vadd.f32 %v927_v5, %v1667_v12  ;;  %v929_v32 = vpop.f32.mrb[11].mxu1 }
 0x28f   :  { %979 = vst [vmem:[#allocation8 + $0x88] sm:$0xff] %v926_v29  ;;  %v930_v11 = vadd.f32 %v929_v32, %v1670_v19 }
 0x290   :  { %980 = vst [vmem:[#allocation8 + $0x90] sm:$0xff] %v928_v30 }
 0x291   :  { %981 = vst [vmem:[#allocation8 + $0x98] sm:$0xff] %v930_v11 }
 0x293   :  { %v933_v37 = vpop.f32.mrb[12].mxu1 }
 0x294   :  { %v934_v34 = vadd.f32 %v933_v37, %v1667_v12  ;;  %v935_v35 = vpop.f32.mrb[13].mxu1 }
 0x295   :  { %v936_v47 = vadd.f32 %v935_v35, %v1670_v19  ;;  %v937_v38 = vpop.f32.mrb[14].mxu1 }
 0x296   :  { %982 = vst [vmem:[#allocation8 + $0xa0] sm:$0xff] %v934_v34  ;;  %v938_v39 = vadd.f32 %v937_v38, %v1667_v12  ;;  %v939_v43 = vpop.f32.mrb[15].mxu1 }
 0x297   :  { %983 = vst [vmem:[#allocation8 + $0xa8] sm:$0xff] %v936_v47  ;;  %v940_v42 = vadd.f32 %v939_v43, %v1670_v19 }
 0x298   :  { %984 = vst [vmem:[#allocation8 + $0xb0] sm:$0xff] %v938_v39 }
 0x299   :  { %985 = vst [vmem:[#allocation8 + $0xb8] sm:$0xff] %v940_v42 }
 0x29b   :  { %v943_v56 = vpop.f32.mrb[16].mxu1 }
 0x29c   :  { %v944_v44 = vadd.f32 %v943_v56, %v1667_v12  ;;  %v945_v53 = vpop.f32.mrb[17].mxu1 }
 0x29d   :  { %v946_v45 = vadd.f32 %v945_v53, %v1670_v19  ;;  %v947_v48 = vpop.f32.mrb[18].mxu1 }
 0x29e   :  { %986 = vst [vmem:[#allocation8 + $0xc0] sm:$0xff] %v944_v44  ;;  %v948_v51 = vadd.f32 %v947_v48, %v1667_v12  ;;  %v949_v3 = vpop.f32.mrb[19].mxu1 }
 0x29f   :  { %987 = vst [vmem:[#allocation8 + $0xc8] sm:$0xff] %v946_v45  ;;  %v950_v16 = vadd.f32 %v949_v3, %v1670_v19 }
 0x2a0   :  { %988 = vst [vmem:[#allocation8 + $0xd0] sm:$0xff] %v948_v51 }
 0x2a1   :  { %989 = vst [vmem:[#allocation8 + $0xd8] sm:$0xff] %v950_v16 }
 0x2a3   :  { %v953_v52 = vpop.f32.mrb[20].mxu1 }
 0x2a4   :  { %v954_v55 = vadd.f32 %v953_v52, %v1667_v12  ;;  %v955_v60 = vpop.f32.mrb[21].mxu1 }
 0x2a5   :  { %v956_v1 = vadd.f32 %v955_v60, %v1670_v19  ;;  %v957_v6 = vpop.f32.mrb[22].mxu1 }
 0x2a6   :  { %990 = vst [vmem:[#allocation8 + $0xe0] sm:$0xff] %v954_v55  ;;  %v958_v25 = vadd.f32 %v957_v6, %v1667_v12  ;;  %v959_v36 = vpop.f32.mrb[23].mxu1 }
 0x2a7   :  { %991 = vst [vmem:[#allocation8 + $0xe8] sm:$0xff] %v956_v1  ;;  %v960_v46 = vadd.f32 %v959_v36, %v1670_v19 }
 0x2a8   :  { %992 = vst [vmem:[#allocation8 + $0xf0] sm:$0xff] %v958_v25 }
 0x2a9   :  { %993 = vst [vmem:[#allocation8 + $0xf8] sm:$0xff] %v960_v46 }
 0x2aa   :  { %1273 = shalt.err (!%p1270_p0)
}
 0x2ab   :  { %s1274_s18 = scalar_lea.hbm %s1722_s6, 4096 }
 0x2ac   :  { %p1275_p1 = scmp.ne.s32.totalorder %s1722_s6, %s1274_s18  ;;  %p1278_p2 = scmp.lt.u32.totalorder %s1274_s18, %s1722_s6 }
 0x2ae   :  { %p1280_p3 = pnand %p1278_p2, %p1275_p1 }
 0x2b0   :  { %1283 = shalt.err (!%p1280_p3)
}
 0x2b1   :  { %s1300_s22 = smov 256   ;;  %s1301_s23 = smov 16  }
 0x2b2   :  { %1005 = dma.vmem_to_hbm [thread:$0]  %s1000_s14, 4096, %s1722_s6, [#allocation4], %s1300_s22, %s1300_s22, %s1301_s23  }
 0x2b3   :  { %1288 = dma.done.wait [#allocation4], 4096  }
 0x2b4   :  { %1289 = vsyncadd [#allocation4], 4294963200 }
 0x2b5   :  { %1009 = vsyncpa [#allocation3], 1 }
 0x2b6   :  { %1010 = vsyncpa [#allocation6], 1 }
 0x2b7   :  { %1011 = vsyncpa [#allocation4], 1 }

</bundles_post_ra>
